<compile_context>
chip_gen: v6e
topology: v6e:2x2x1
jax: 0.10.0
libtpu: 0.0.40
codegen_flags: <defaults>
</compile_context>

<pallas_src>
import jax
import jax.numpy as jnp
from jax.experimental import pallas as pl
from jax.experimental.pallas import tpu as pltpu


_GATHER_CHUNK = 8  # rows per DMA chunk in the HBM-gather path (tb is a multiple of 8)


def _round_up(x: int, m: int) -> int:
    return (x + m - 1) // m * m


def _softmax_argmax(q, probs_ref, action_ref):
    """q: (tb, A) f32 gathered Q rows -> probs (tb, A), greedy action (tb, 1)."""
    m = jnp.max(q, axis=-1, keepdims=True)
    e = jnp.exp(q - m)
    denom = jnp.sum(e, axis=-1, keepdims=True)
    inv = pl.reciprocal(denom, approx=True)        # EUP slot (nearly free)
    inv = inv * (2.0 - denom * inv)                # one Newton step -> f32 accurate
    probs_ref[...] = (e * inv).astype(probs_ref.dtype)
    # Greedy argmax on the gathered row (first occurrence, matching jnp.argmax).
    lane = jax.lax.broadcasted_iota(jnp.int32, q.shape, 1)
    first_max = jnp.min(jnp.where(q == m, lane, q.shape[-1]),
                        axis=-1, keepdims=True)
    action_ref[...] = first_max.astype(jnp.int32)


def _resident_kernel(state_sref, q_ref, probs_ref, action_ref, stage):
    # state_sref: SMEM (bpad,) int32   -- all state indices (scalar prefetch)
    # q_ref     : VMEM (S, A)  f32     -- whole Q table, resident (constant block)
    # probs_ref : VMEM (tb, A) f32     -- softmax over actions (output)
    # action_ref: VMEM (tb, 1) int32   -- greedy action (output)
    # stage     : VMEM (tb, A) f32     -- gathered Q rows
    b = pl.program_id(0)
    tb = stage.shape[0]
    num_states = q_ref.shape[0]
    base = b * tb

    def gather_row(i, carry):
        s = jnp.clip(state_sref[base + i], 0, num_states - 1)
        stage[pl.ds(i, 1), :] = q_ref[pl.ds(s, 1), :]
        return carry

    jax.lax.fori_loop(0, tb, gather_row, 0, unroll=False)
    _softmax_argmax(stage[...], probs_ref, action_ref)


def _hbm_gather_kernel(state_sref, q_hbm, probs_ref, action_ref, stage, sem):
    # q_hbm: raw HBM ref (S, A).  Fetch exactly the tb rows this tile needs with
    # double-buffered chunks of _GATHER_CHUNK row-DMAs (parity semaphores, waits
    # use the true destination rows so later reads stay ordered after the wait).
    b = pl.program_id(0)
    tb = stage.shape[0]
    num_states = q_hbm.shape[0]
    base = b * tb
    chunk = _GATHER_CHUNK
    nchunks = tb // chunk

    def issue_chunk(c):
        def issue_row(j, carry):
            r = c * chunk + j
            s = jnp.clip(state_sref[base + r], 0, num_states - 1)
            pltpu.make_async_copy(q_hbm.at[pl.ds(s, 1), :],
                                  stage.at[pl.ds(r, 1), :],
                                  sem.at[c % 2]).start()
            return carry
        jax.lax.fori_loop(0, chunk, issue_row, 0, unroll=True)

    def wait_chunk(c):
        # All `chunk` row-DMAs of chunk c signal sem[c % 2]; by construction no
        # other copies are outstanding on that semaphore, so a single wait sized
        # to the full chunk waits for exactly those rows.
        pltpu.make_async_copy(q_hbm.at[pl.ds(0, chunk), :],
                              stage.at[pl.ds(c * chunk, chunk), :],
                              sem.at[c % 2]).wait()

    issue_chunk(0)

    def steady(c, carry):
        issue_chunk(c + 1)        # prefetch next chunk while chunk c lands
        wait_chunk(c)
        return carry

    jax.lax.fori_loop(0, nchunks - 1, steady, 0, unroll=False)
    wait_chunk(nchunks - 1)

    _softmax_argmax(stage[...], probs_ref, action_ref)


def tabular_policy_forward(Q: jax.Array, state: jax.Array, *,
                           batch_tile: int = 512,
                           force_hbm_gather: bool = False):
    """Returns (probs, greedy_action) for a batch of discrete states."""
    num_states, num_actions = Q.shape
    batch = state.shape[0]
    Q = Q.astype(jnp.float32)
    state = state.astype(jnp.int32)

    # ---- VMEM budget: ~2/3 of physical leaves headroom for Mosaic scratch ----
    try:
        vmem_phys = int(pltpu.get_tpu_info().vmem_capacity_bytes)
    except Exception:
        vmem_phys = 64 * 1024 * 1024          # conservative (v7x-sized) fallback
    vmem_budget = int(vmem_phys * 2 // 3)

    # ---- batch tiling: >= 2 tiles once batch >= 16 so v7x's 2 TCs both work ----
    tb = min(batch_tile, max(8, _round_up((batch + 1) // 2, 8)))
    tb = max(8, _round_up(tb, 8))
    bpad = _round_up(batch, tb)
    nb = bpad // tb

    # ---- lane-padding-aware VMEM accounting (all 4-byte elements) ----
    lanes_a = max(_round_up(num_actions, 128), 128)
    fixed_bytes = 4 * (2 * tb * lanes_a       # probs output (double-buffered)
                       + 2 * tb * 128         # (tb, 1) action pads to 128 lanes
                       + tb * lanes_a)        # stage scratch
    q_resident_bytes = 2 * num_states * lanes_a * 4   # BlockSpec double-buffer
    resident = fixed_bytes + q_resident_bytes <= vmem_budget
    if num_states < _GATHER_CHUNK:
        resident = True                        # tiny table: always keep in VMEM
    elif force_hbm_gather:
        resident = False

    # Padded batch rows gather state 0 (valid); they are sliced off below.
    if bpad != batch:
        state = jnp.pad(state, (0, bpad - batch))

    out_shape = (jax.ShapeDtypeStruct((bpad, num_actions), jnp.float32),
                 jax.ShapeDtypeStruct((bpad, 1), jnp.int32))
    out_specs = [pl.BlockSpec((tb, num_actions), lambda b, st: (b, 0)),
                 pl.BlockSpec((tb, 1), lambda b, st: (b, 0))]

    if resident:
        kernel = _resident_kernel
        in_specs = [pl.BlockSpec((num_states, num_actions), lambda b, st: (0, 0))]
        scratch = [pltpu.VMEM((tb, num_actions), jnp.float32)]
    else:
        kernel = _hbm_gather_kernel
        in_specs = [pl.BlockSpec(memory_space=pl.ANY)]      # Q stays in HBM
        scratch = [pltpu.VMEM((tb, num_actions), jnp.float32),
                   pltpu.SemaphoreType.DMA((2,))]

    grid_spec = pltpu.PrefetchScalarGridSpec(
        num_scalar_prefetch=1,                 # state indices -> SMEM
        grid=(nb,),
        in_specs=in_specs,
        out_specs=out_specs,
        scratch_shapes=scratch,
    )

    probs, action = pl.pallas_call(
        kernel,
        out_shape=out_shape,
        grid_spec=grid_spec,
        compiler_params=pltpu.CompilerParams(
            dimension_semantics=("parallel",),
            vmem_limit_bytes=vmem_budget,
        ),
    )(state, Q)

    return probs[:batch], action[:batch, 0]


if __name__ == "__main__":
    key = jax.random.PRNGKey(0)
    k_q1, k_s1, k_q2, k_s2 = jax.random.split(key, 4)

    # Case 1: small table -> resident-Q path.
    s1, a1dim, b1 = 16, 128, 8
    Q1 = jax.random.normal(k_q1, (s1, a1dim), dtype=jnp.float32)
    st1 = jax.random.randint(k_s1, (b1,), 0, s1, dtype=jnp.int32)
    p1, act1 = tabular_policy_forward(Q1, st1)
    p1 = jax.block_until_ready(p1)
    act1 = jax.block_until_ready(act1)
    ref_p1 = jax.nn.softmax(Q1[st1], axis=-1)
    ref_a1 = jnp.argmax(Q1[st1], axis=-1).astype(jnp.int32)
    assert p1.shape == (b1, a1dim) and act1.shape == (b1,)
    assert jnp.allclose(p1, ref_p1, atol=1e-5, rtol=1e-5)
    assert jnp.array_equal(act1, ref_a1)

    # Case 2: ragged shapes + 2 batch tiles (with padding), forced HBM row-gather path.
    s2, a2dim, b2 = 40, 64, 24
    Q2 = jax.random.normal(k_q2, (s2, a2dim), dtype=jnp.float32)
    st2 = jax.random.randint(k_s2, (b2,), 0, s2, dtype=jnp.int32)
    p2, act2 = tabular_policy_forward(Q2, st2, force_hbm_gather=True)
    p2 = jax.block_until_ready(p2)
    act2 = jax.block_until_ready(act2)
    ref_p2 = jax.nn.softmax(Q2[st2], axis=-1)
    ref_a2 = jnp.argmax(Q2[st2], axis=-1).astype(jnp.int32)
    assert p2.shape == (b2, a2dim) and act2.shape == (b2,)
    assert jnp.allclose(p2, ref_p2, atol=1e-5, rtol=1e-5)
    assert jnp.array_equal(act2, ref_a2)

    print("KERNEL_OK")
</pallas_src>

<mosaic_0001>
module attributes {stable_mosaic.version = 11 : i64} {
  func.func @_resident_kernel(%arg0: i32, %arg1: memref<8xi32, #tpu.memory_space<smem>>, %arg2: memref<16x128xf32, #tpu.memory_space<vmem>>, %arg3: memref<8x128xf32, #tpu.memory_space<vmem>>, %arg4: memref<8x1xi32, #tpu.memory_space<vmem>>, %arg5: memref<8x128xf32, #tpu.memory_space<vmem>>) attributes {dimension_semantics = [#tpu.dimension_semantics<parallel>], iteration_bounds = array<i64: 1>, scalar_prefetch = 1 : i64, scratch_operands = 1 : i64, tpu.core_type = #tpu.core_type<tc>, window_params = [{pipeline_mode = #tpu.pipeline_mode<synchronous>, transform_indices = @transform_0, window_bounds = array<i64: 16, 128>}, {transform_indices = @transform_1, window_bounds = array<i64: 8, 128>}, {transform_indices = @transform_2, window_bounds = array<i64: 8, 1>}]} {
    %c8_i32 = arith.constant 8 : i32
    %0 = arith.muli %arg0, %c8_i32 : i32
    %c0_i32 = arith.constant 0 : i32
    %c8_i32_0 = arith.constant 8 : i32
    %1 = arith.addi %c0_i32, %c8_i32_0 : i32
    %c1_i32 = arith.constant 1 : i32
    scf.for %arg6 = %c0_i32 to %1 step %c1_i32  : i32 {
      %26 = arith.addi %0, %arg6 : i32
      %27 = arith.index_cast %26 : i32 to index
      %28 = memref.load %arg1[%27] : memref<8xi32, #tpu.memory_space<smem>>
      %c0_i32_10 = arith.constant 0 : i32
      %c15_i32 = arith.constant 15 : i32
      %29 = arith.maxsi %c0_i32_10, %28 : i32
      %30 = arith.minsi %c15_i32, %29 : i32
      %31 = arith.index_cast %30 : i32 to index
      %c0_11 = arith.constant 0 : index
      %32 = vector.load %arg2[%31, %c0_11] : memref<16x128xf32, #tpu.memory_space<vmem>>, vector<1x128xf32>
      %33 = arith.index_cast %arg6 : i32 to index
      %c0_12 = arith.constant 0 : index
      %34 = vector.load %arg5[%33, %c0_12] : memref<8x128xf32, #tpu.memory_space<vmem>>, vector<1x128xf32>
      tpu.vector_store %arg5[%33, %c0_12], %32 {strides = array<i32>} : memref<8x128xf32, #tpu.memory_space<vmem>>, vector<1x128xf32>,
    }
    %c8_i32_1 = arith.constant 8 : i32
    %c0 = arith.constant 0 : index
    %c0_2 = arith.constant 0 : index
    %2 = vector.load %arg5[%c0, %c0_2] : memref<8x128xf32, #tpu.memory_space<vmem>>, vector<8x128xf32>
    %cst = arith.constant dense<0xFF800000> : vector<8xf32>
    %3 = vector.multi_reduction <maximumf>, %2, %cst [1] : vector<8x128xf32> to vector<8xf32>
    %4 = vector.shape_cast %3 : vector<8xf32> to vector<8x1xf32>
    %5 = vector.broadcast %4 : vector<8x1xf32> to vector<8x128xf32>
    %6 = arith.subf %2, %5 : vector<8x128xf32>
    %7 = math.exp %6 : vector<8x128xf32>
    %cst_3 = arith.constant dense<0.000000e+00> : vector<8xf32>
    %8 = vector.multi_reduction <add>, %7, %cst_3 [1] : vector<8x128xf32> to vector<8xf32>
    %9 = vector.shape_cast %8 : vector<8xf32> to vector<8x1xf32>
    %10 = tpu.reciprocal %9 {approx = true} : vector<8x1xf32> -> vector<8x1xf32>
    %11 = arith.mulf %9, %10 : vector<8x1xf32>
    %cst_4 = arith.constant 2.000000e+00 : f32
    %12 = vector.broadcast %cst_4 : f32 to vector<8x1xf32>
    %13 = arith.subf %12, %11 : vector<8x1xf32>
    %14 = arith.mulf %10, %13 : vector<8x1xf32>
    %15 = vector.broadcast %14 : vector<8x1xf32> to vector<8x128xf32>
    %16 = arith.mulf %7, %15 : vector<8x128xf32>
    %c0_5 = arith.constant 0 : index
    %c0_6 = arith.constant 0 : index
    %17 = vector.load %arg3[%c0_5, %c0_6] : memref<8x128xf32, #tpu.memory_space<vmem>>, vector<8x128xf32>
    tpu.vector_store %arg3[%c0_5, %c0_6], %16 {strides = array<i32>} : memref<8x128xf32, #tpu.memory_space<vmem>>, vector<8x128xf32>,
    %18 = tpu.iota {dimensions = array<i32: 1>} : vector<8x128xi32>
    %19 = vector.broadcast %4 : vector<8x1xf32> to vector<8x128xf32>
    %20 = arith.cmpf oeq, %2, %19 : vector<8x128xf32>
    %c128_i32 = arith.constant 128 : i32
    %21 = vector.broadcast %c128_i32 : i32 to vector<8x128xi32>
    %22 = arith.select %20, %18, %21 : vector<8x128xi1>, vector<8x128xi32>
    %cst_7 = arith.constant dense<2147483647> : vector<8xi32>
    %23 = vector.multi_reduction <minsi>, %22, %cst_7 [1] : vector<8x128xi32> to vector<8xi32>
    %24 = vector.shape_cast %23 : vector<8xi32> to vector<8x1xi32>
    %c0_8 = arith.constant 0 : index
    %c0_9 = arith.constant 0 : index
    %25 = vector.load %arg4[%c0_8, %c0_9] : memref<8x1xi32, #tpu.memory_space<vmem>>, vector<8x1xi32>
    tpu.vector_store %arg4[%c0_8, %c0_9], %24 {strides = array<i32>} : memref<8x1xi32, #tpu.memory_space<vmem>>, vector<8x1xi32>,
    return
  }
  func.func @transform_0(%arg0: i32, %arg1: memref<8xi32, #tpu.memory_space<smem>>) -> (i32, i32) {
    %c0_i32 = arith.constant 0 : i32
    %c0_i32_0 = arith.constant 0 : i32
    %c0_i32_1 = arith.constant 0 : i32
    return %c0_i32, %c0_i32_0 : i32, i32
  }
  func.func @transform_1(%arg0: i32, %arg1: memref<8xi32, #tpu.memory_space<smem>>) -> (i32, i32) {
    %c0_i32 = arith.constant 0 : i32
    %c0_i32_0 = arith.constant 0 : i32
    return %arg0, %c0_i32 : i32, i32
  }
  func.func @transform_2(%arg0: i32, %arg1: memref<8xi32, #tpu.memory_space<smem>>) -> (i32, i32) {
    %c0_i32 = arith.constant 0 : i32
    %c0_i32_0 = arith.constant 0 : i32
    return %arg0, %c0_i32 : i32, i32
  }
}

</mosaic_0001>

<bundles_post_ra>
// kernel: tpu_custom_call.1
= control target key start
LH: loop header
LB: loop body
LE: loop exit
PB: predicated region body
PF: predicated region fallthrough
CT: control target
= control target key end

     0   :  { %s193_s12 = smov [#allocation4]   ;;  %s230_s0 = inlined_call_operand.hbm [shape: s32[8], index: 0, kind: input, shape index: {}]   ;;  %s231_s1 = inlined_call_operand.hbm [shape: f32[16,128], index: 1, kind: input, shape index: {}]   ;;  %s232_s2 = inlined_call_operand.hbm [shape: f32[8,128], index: 2, kind: output, shape index: {0}]   ;;  %s233_s3 = inlined_call_operand.vmem [shape: s32[8,1], index: 3, kind: output, shape index: {1}]  }
   0x1   :  { %10 = dma.hbm_to_smem %s230_s0, 16, %s193_s12, [#allocation3] }
   0x2   :  { %183 = dma.done.wait [#allocation3], 16 }
   0x3   :  { %184 = vsyncadd [#allocation3], 4294967280 }
   0x4   :  { %12 = sfence }
   0x5   :  { %13 = vsyncpa [#allocation6], 0 }
   0x6   :  { %14 = vsyncpa [#allocation7], 0  ;;  %s194_s15 = smov [#allocation5]  }
   0x7   :  { %s20_s16 = sshll.u32 %s194_s15, 4  ;;  %s21_s16 = int_to_ptr.vmem [resolvable:$true] %s20_s16 }
   0x8   :  { %s147_s17 = scalar_lea.vmem %s21_s16, 256  ;;  %p152_p1 = scmp.lt.s32.totalorder %s21_s16, %s21_s16 }
   0x9   :  { %p148_p0 = scmp.ne.s32.totalorder %s21_s16, %s147_s17  ;;  %p153_p2 = scmp.lt.s32.totalorder %s147_s17, %s147_s17 }
   0xb   :  { %p154_p3 = por %p153_p2, %p152_p1 }
   0xd   :  { %p155_p4 = pnand %p154_p3, %p148_p0 }
   0xf   :  { %158 = shalt.err (!%p155_p4)
}
  0x10   :  { %s195_s18 = smov 128   ;;  %s196_s19 = smov 8  }
  0x11   :  { %26 = dma.hbm_to_vmem [thread:$0]  %s231_s1, 256, %s21_s16, [#allocation6], %s195_s18, %s195_s18, %s196_s19  }
  0x12   :  { %185 = dma.done.wait [#allocation6], 256  }
  0x13   :  { %186 = vsyncadd [#allocation6], 4294967040  ;;  %s189_s0 = smov 0  }
  0x14 LB: > { %s38_s22 = sld [smem:[#allocation4 + %s191_s0]]  ;;  %s45_s24 = scalar_lea.vmem [#allocation2], %s191_s0  ;;  %s191_s0 = sphi %s189_s0, %s36_s0  }
  0x15   : > { %s36_s0 = sadd.s32 1, %s191_s0  }
  0x16   : > { %p33_p7 = scmp.ge.s32.totalorder %s36_s0, 8  }
  0x17   :  { %v61_v2 = vlaneseq (%p33_p7)  ;;  %s197_s1 = smov (%p33_p7), [#allocation8]  }
  0x18   :  { %s87_s25 = sshll.u32 (%p33_p7), %s197_s1, 4  ;;  %s88_s25 = int_to_ptr.vmem [resolvable:$true] %s87_s25 }
  0x19   :  { %v62_v3 = vand.u32 (%p33_p7), 127, %v61_v2  ;;  %s159_s26 = scalar_lea.vmem (%p33_p7), %s88_s25, 128  ;;  %p164_p9 = scmp.lt.s32.totalorder (%p33_p7), %s88_s25, %s88_s25 }
  0x1a   : > { %p39_p5 = scmp.gt.s32.totalorder %s38_s22, 0  ;;  %p107_p6 = scmp.lt.s32.totalorder %s38_s22, 15 }
  0x1b   :  { %p160_p8 = scmp.ne.s32.totalorder (%p33_p7), %s88_s25, %s159_s26  ;;  %p165_p10 = scmp.lt.s32.totalorder (%p33_p7), %s159_s26, %s159_s26 }
  0x1c   : > { %s235_s22 = smov (!%p39_p5, %s38_s22), 0  ;;  %35 = sbr.rel (!%p33_p7) target bundleno = 20 (0x14), region = 45 }
  0x1d   : > { %s237_s22 = smov (!%p107_p6, %s235_s22), 15  ;;  %p166_p11 = por (%p33_p7), %p165_p10, %p164_p9 }
  0x1e   : > { %s43_s23 = scalar_lea.vmem [#allocation5], %s237_s22 }
  0x1f   : > { %v44_v0 = vld [vmem:[%s43_s23] sm:$0x1]  ;;  %p167_p12 = pnand (%p33_p7), %p166_p11, %p160_p8 }
  0x20   : > { %46 = vst [vmem:[%s45_s24] sm:$0x1] %v44_v0 }
  0x27   :  { %v47_v1 = vld [vmem:[#allocation2] sm:$0xff] }
  0x28   :  { %48 = vmax.xlane.f32.xlu0 %v47_v1 }
  0xb1   :  { %v49_v4 = vpop.xlane.xlu0 %48 }
  0xb2   :  { %v50_v5 = vsub.f32 %v47_v1, %v49_v4  ;;  %vm63_vm0 = vcmp.eq.f32.partialorder %v47_v1, %v49_v4 }
  0xb3   :  { %v64_v6 = vsel %vm63_vm0, %v62_v3, 128 }
  0xb4   :  { %v51_v7 = vmul.f32 1.442695, %v50_v5  ;;  %v66_v8 = vshra.s32 %v64_v6, 16  ;;  %v65_v11 = vand.u32 65535, %v64_v6 }
  0xb6   :  { %127 = vpow2.f32 %v51_v7  ;;  %v68_v9 = vcvt.s32.f32 %v66_v8  ;;  %v67_v13 = vcvt.s32.f32 %v65_v11 }
  0xb8   :  { %69 = vmin.xlane.f32.xlu0 %v68_v9 }
  0xc3   :  { %v128_v10 = vpop.eup %127 }
  0xc4   :  { %53 = vadd.xlane.f32.xlu1 %v128_v10 }
 0x141   :  { %v70_v12 = vpop.xlane.xlu0 %69 }
 0x142   :  { %vm71_vm1 = vcmp.eq.f32.partialorder %v68_v9, %v70_v12 }
 0x143   :  { %v72_v14 = vsel %vm71_vm1, %v67_v13, inf }
 0x144   :  { %73 = vmin.xlane.f32.xlu1 %v72_v14 }
 0x14d   :  { %v54_v15 = vpop.xlane.xlu1 %53 }
 0x14e   :  { %129 = vrcp.f32 %v54_v15 }
 0x15b   :  { %v130_v16 = vpop.eup %129 }
 0x15c   :  { %v56_v17 = vmul.f32 %v130_v16, %v54_v15 }
 0x15e   :  { %v57_v18 = vsub.f32 2.0, %v56_v17 }
 0x160   :  { %v58_v19 = vmul.f32 %v130_v16, %v57_v18 }
 0x162   :  { %v59_v20 = vmul.f32 %v128_v10, %v58_v19 }
 0x164   :  { %60 = vst [vmem:[#allocation8] sm:$0xff] %v59_v20 }
 0x165   :  { %170 = shalt.err (!%p167_p12)
}
 0x166   :  { %90 = dma.vmem_to_hbm [thread:$0]  %s88_s25, 128, %s232_s2, [#allocation7]   ;;  %v76_v21 = vcvt.f32.s32 %v70_v12  ;;  %vm79_vm2 = vcmask 7168  }
 0x168   :  { %v77_v23 = vshll.u32 %v76_v21, 16 }
 0x1cd   :  { %v74_v22 = vpop.xlane.xlu1 %73 }
 0x1ce   :  { %v75_v24 = vcvt.f32.s32 %v74_v22 }
 0x1d0   :  { %v78_v25 = vadd.s32 %v77_v23, %v75_v24 }
 0x1d2   :  { %80 = vst.msk [vmem:[%s233_s3] sm:$0xff] %vm79_vm2, %v78_v25 }
 0x1d3   :  { %187 = dma.done.wait [#allocation7], 128  }
 0x1d4   :  { %188 = vsyncadd [#allocation7], 4294967168 }
 0x1d5   :  { %98 = vsyncpa [#allocation6], 1 }
 0x1d6   :  { %99 = vsyncpa [#allocation7], 1 }

</bundles_post_ra>
